<compile_context>
chip_gen: v7x
topology: tpu7x:2x2x1
jax: 0.10.0
libtpu: 0.0.40
codegen_flags: <defaults>
</compile_context>

<pallas_src>
import functools

import jax
import jax.numpy as jnp
from jax.experimental import pallas as pl
from jax.experimental.pallas import tpu as pltpu


# --------------------------------------------------------------------------
# Fused kernel: conv1x1 (+folded BN) + ReLU + pixel-shuffle-space blur
# --------------------------------------------------------------------------
def _fused_upshuffle_kernel(x_ref, w_ref, b_ref, o_ref, *, H, W, scale, use_mxu):
    """Block shapes per grid step (n, g):
         x_ref : (1, C_in, H*W)            activations, spatial flattened on lanes
         w_ref : (scale^2, nf_t, C_in)     BN-scale-folded weights, group-major
         b_ref : (scale^2, nf_t, 1)        BN shift, group-major
         o_ref : (1, scale^2, nf_t, H*W)   blurred output, still pre-shuffle order
    """
    HW = H * W
    s = scale
    x = x_ref[0].astype(jnp.float32)                      # (C_in, HW)
    C_in = x.shape[0]

    # Edge masks over the flattened spatial (lane) axis.
    pos = jax.lax.broadcasted_iota(jnp.int32, (1, HW), 1)
    row0 = pos < W                                        # h == 0
    col0 = (pos % W) == 0                                 # w == 0

    def shift_right(v, amt):
        # result[:, p] == v[:, p - amt] for p >= amt.  The first `amt` lanes are
        # filler: every lane where the shift would cross the top/left image border
        # is overwritten by the edge-replication selects below, so this is
        # equivalent to pltpu.roll(v, amt, axis=-1) on all consumed lanes.
        amt = min(amt, HW)
        if amt >= HW:
            return v                                      # fully masked anyway
        return jnp.concatenate([v[:, :amt], v[:, :-amt]], axis=-1)

    # --- 1x1 conv (per sub-pixel group) + folded BN + ReLU -----------------
    y = []
    for g in range(s * s):
        wg = w_ref[g].astype(jnp.float32)                 # (nf_t, C_in)
        if use_mxu:
            acc = jnp.dot(wg, x, preferred_element_type=jnp.float32)
        else:
            # Tiny-channel regime: K << 128 wastes the MXU; do a VPU broadcast
            # multiply-accumulate with the spatial axis lane-dense.
            acc = wg[:, 0:1] * x[0:1, :]
            for k in range(1, C_in):
                acc = acc + wg[:, k:k + 1] * x[k:k + 1, :]
        y.append(jnp.maximum(acc + b_ref[g], 0.0))        # (nf_t, HW) f32
    yg = [[y[r * s + c] for c in range(s)] for r in range(s)]

    # --- ReplicationPad2d((1,0,1,0)) + AvgPool2d(2, stride=1), evaluated in
    # --- pre-shuffle coordinates -------------------------------------------
    for r in range(s):
        for c in range(s):
            ctr = yg[r][c]
            if r > 0:
                up = yg[r - 1][c]
            else:
                up = jnp.where(row0, yg[0][c], shift_right(yg[s - 1][c], W))
            if c > 0:
                left = yg[r][c - 1]
            else:
                left = jnp.where(col0, yg[r][0], shift_right(yg[r][s - 1], 1))
            if r > 0 and c > 0:
                upleft = yg[r - 1][c - 1]
            elif r > 0:          # c == 0
                upleft = jnp.where(col0, yg[r - 1][0],
                                   shift_right(yg[r - 1][s - 1], 1))
            elif c > 0:          # r == 0
                upleft = jnp.where(row0, yg[0][c - 1],
                                   shift_right(yg[s - 1][c - 1], W))
            else:                # r == 0 and c == 0
                upleft = jnp.where(
                    row0, left,
                    jnp.where(col0, up, shift_right(yg[s - 1][s - 1], W + 1)))
            o_ref[0, r * s + c] = (0.25 * (ctr + up + left + upleft)).astype(o_ref.dtype)


# --------------------------------------------------------------------------
# Wrapper: parameter folding, pallas_call, final pixel-shuffle interleave
# --------------------------------------------------------------------------
def custom_pixel_shuffle_icnr(x_nchw, params, scale=2, eps=1e-5):
    N, C_in, H, W = x_nchw.shape
    w = params["w"]                                       # (C_out, C_in)
    C_out = w.shape[0]
    s2 = scale * scale
    nf = C_out // s2
    HW = H * W

    # Fold BN (eval mode) scale into the conv weights; keep only an additive shift.
    bn_scale = params["gamma"] / jnp.sqrt(params["var"] + eps)        # (C_out,)
    bn_shift = params["beta"] - params["mean"] * bn_scale
    w_folded = w * bn_scale[:, None]
    # Regroup channels sub-pixel-group-major (tiny one-time XLA ops).
    w_g = w_folded.reshape(nf, s2, C_in).transpose(1, 0, 2)           # (s2, nf, C_in)
    b_g = bn_shift.reshape(nf, s2).T.reshape(s2, nf, 1)               # (s2, nf, 1)

    x_flat = x_nchw.reshape(N, C_in, HW)                  # free view: spatial on lanes

    nf_t = nf                                             # single feature tile (small nf)
    grid = (N, nf // nf_t)

    kernel = functools.partial(_fused_upshuffle_kernel, H=H, W=W, scale=scale,
                               use_mxu=(C_in >= 32))

    out = pl.pallas_call(
        kernel,
        out_shape=jax.ShapeDtypeStruct((N, s2, nf, HW), x_nchw.dtype),
        grid_spec=pltpu.PrefetchScalarGridSpec(
            num_scalar_prefetch=0,
            grid=grid,
            in_specs=[
                pl.BlockSpec((1, C_in, HW), lambda n, g: (n, 0, 0)),
                pl.BlockSpec((s2, nf_t, C_in), lambda n, g: (0, g, 0)),
                pl.BlockSpec((s2, nf_t, 1), lambda n, g: (0, g, 0)),
            ],
            out_specs=pl.BlockSpec((1, s2, nf_t, HW), lambda n, g: (n, 0, g, 0)),
        ),
        compiler_params=pltpu.CompilerParams(
            dimension_semantics=("parallel", "parallel"),
            vmem_limit_bytes=32 * 1024 * 1024,
        ),
    )(x_flat, w_g, b_g)

    # TODO(synk): the final sub-pixel interleave (strided NCHW store) is done as one
    # XLA transpose; an in-kernel version would need lane-interleaving/strided stores.
    out = out.reshape(N, scale, scale, nf, H, W)          # [n, r, c, f, h, w]
    out = jnp.transpose(out, (0, 3, 4, 1, 5, 2))          # [n, f, h, r, w, c]
    return out.reshape(N, nf, H * scale, W * scale)


# --------------------------------------------------------------------------
# Deterministic synthetic parameters (ICNR-structured 1x1 conv + BN stats)
# --------------------------------------------------------------------------
def init_params(key, ni, nf, scale=2):
    kw, kj, kg, kb, km, kv = jax.random.split(key, 6)
    std = jnp.sqrt(2.0 / ni)                              # kaiming_normal, fan-in
    k0 = jax.random.normal(kw, (nf, ni), jnp.float32) * std
    w = jnp.repeat(k0, scale * scale, axis=0)             # ICNR: replicated sub-pixel kernels
    # tiny perturbation so every output channel is distinct -> the correctness check
    # below is sensitive to any channel-order / sub-pixel-group mix-up in the kernel.
    w = w + 0.01 * jax.random.normal(kj, w.shape, jnp.float32)
    c_out = nf * scale * scale
    gamma = jax.random.uniform(kg, (c_out,), jnp.float32, 0.5, 1.5)
    beta = 0.1 * jax.random.normal(kb, (c_out,), jnp.float32)
    mean = 0.1 * jax.random.normal(km, (c_out,), jnp.float32)
    var = jax.random.uniform(kv, (c_out,), jnp.float32, 0.5, 1.5)
    return dict(w=w, gamma=gamma, beta=beta, mean=mean, var=var)


# --------------------------------------------------------------------------
# Pure-JAX reference for the correctness check
# --------------------------------------------------------------------------
def reference(x, params, scale=2, eps=1e-5):
    w = params["w"]                                       # (C_out, C_in)
    y = jnp.einsum("nchw,oc->nohw", x, w)
    s = params["gamma"] / jnp.sqrt(params["var"] + eps)
    b = params["beta"] - params["mean"] * s
    y = jnp.maximum(y * s[None, :, None, None] + b[None, :, None, None], 0.0)
    N, C, H, W = y.shape
    nf = C // (scale * scale)
    y = y.reshape(N, nf, scale, scale, H, W)
    y = jnp.transpose(y, (0, 1, 4, 2, 5, 3)).reshape(N, nf, H * scale, W * scale)
    yp = jnp.pad(y, ((0, 0), (0, 0), (1, 0), (1, 0)), mode="edge")
    return 0.25 * (yp[:, :, :-1, :-1] + yp[:, :, :-1, 1:]
                   + yp[:, :, 1:, :-1] + yp[:, :, 1:, 1:])


if __name__ == "__main__":
    key = jax.random.PRNGKey(0)
    kx, kp = jax.random.split(key)

    N, ni, H, W = 2, 4, 16, 16
    nf, scale = 4, 2                                      # module default: nf = ni

    x = jax.random.normal(kx, (N, ni, H, W), jnp.float32)
    params = init_params(kp, ni, nf, scale)

    fwd = jax.jit(functools.partial(custom_pixel_shuffle_icnr, scale=scale))
    out = jax.block_until_ready(fwd(x, params))

    ref = reference(x, params, scale)
    assert out.shape == (N, nf, H * scale, W * scale), out.shape
    max_err = float(jnp.max(jnp.abs(out - ref)))
    assert jnp.allclose(out, ref, rtol=1e-4, atol=1e-4), max_err

    print("KERNEL_OK")
</pallas_src>

<mosaic_0001>
module attributes {stable_mosaic.version = 11 : i64} {
  func.func @_fused_upshuffle_kernel(%arg0: i32, %arg1: i32, %arg2: memref<1x4x256xf32, #tpu.memory_space<vmem>>, %arg3: memref<4x4x4xf32, #tpu.memory_space<vmem>>, %arg4: memref<4x4x1xf32, #tpu.memory_space<vmem>>, %arg5: memref<1x4x4x256xf32, #tpu.memory_space<vmem>>) attributes {dimension_semantics = [#tpu.dimension_semantics<parallel>, #tpu.dimension_semantics<parallel>], iteration_bounds = array<i64: 2, 1>, scalar_prefetch = 0 : i64, scratch_operands = 0 : i64, tpu.core_type = #tpu.core_type<tc>, window_params = [{transform_indices = @transform_0, window_bounds = array<i64: 1, 4, 256>}, {transform_indices = @transform_1, window_bounds = array<i64: 4, 4, 4>}, {transform_indices = @transform_2, window_bounds = array<i64: 4, 4, 1>}, {transform_indices = @transform_3, window_bounds = array<i64: 1, 4, 4, 256>}]} {
    %c0 = arith.constant 0 : index
    %c0_0 = arith.constant 0 : index
    %c0_1 = arith.constant 0 : index
    %0 = vector.load %arg2[%c0, %c0_0, %c0_1] : memref<1x4x256xf32, #tpu.memory_space<vmem>>, vector<1x4x256xf32>
    %1 = vector.shape_cast %0 : vector<1x4x256xf32> to vector<4x256xf32>
    %2 = tpu.iota {dimensions = array<i32: 1>} : vector<1x256xi32>
    %c16_i32 = arith.constant 16 : i32
    %3 = vector.broadcast %c16_i32 : i32 to vector<1x256xi32>
    %4 = arith.cmpi slt, %2, %3 : vector<1x256xi32>
    %c16_i32_2 = arith.constant 16 : i32
    %c0_i32 = arith.constant 0 : i32
    %5 = arith.cmpi eq, %c16_i32_2, %c0_i32 : i32
    %c1_i32 = arith.constant 1 : i32
    %6 = arith.select %5, %c1_i32, %c16_i32_2 : i32
    %7 = vector.broadcast %6 : i32 to vector<1x256xi32>
    %8 = arith.remsi %2, %7 : vector<1x256xi32>
    %c0_i32_3 = arith.constant 0 : i32
    %9 = vector.broadcast %c0_i32_3 : i32 to vector<1x256xi32>
    %10 = arith.cmpi ne, %8, %9 : vector<1x256xi32>
    %c0_i32_4 = arith.constant 0 : i32
    %11 = vector.broadcast %c0_i32_4 : i32 to vector<1x256xi32>
    %12 = arith.cmpi slt, %8, %11 : vector<1x256xi32>
    %c0_i32_5 = arith.constant 0 : i32
    %13 = arith.cmpi slt, %6, %c0_i32_5 : i32
    %14 = vector.broadcast %13 : i1 to vector<1x256xi1>
    %15 = vector.broadcast %14 : vector<1x256xi1> to vector<1x256xi1>
    %16 = arith.xori %12, %15 : vector<1x256xi1>
    %17 = arith.andi %16, %10 : vector<1x256xi1>
    %18 = vector.broadcast %6 : i32 to vector<1x256xi32>
    %19 = arith.addi %8, %18 : vector<1x256xi32>
    %20 = arith.select %17, %19, %8 : vector<1x256xi1>, vector<1x256xi32>
    %c0_i32_6 = arith.constant 0 : i32
    %21 = vector.broadcast %c0_i32_6 : i32 to vector<1x256xi32>
    %22 = arith.cmpi eq, %20, %21 : vector<1x256xi32>
    %c0_7 = arith.constant 0 : index
    %c0_8 = arith.constant 0 : index
    %c0_9 = arith.constant 0 : index
    %23 = vector.load %arg3[%c0_7, %c0_8, %c0_9] : memref<4x4x4xf32, #tpu.memory_space<vmem>>, vector<1x4x4xf32>
    %24 = vector.shape_cast %23 : vector<1x4x4xf32> to vector<4x4xf32>
    %25 = vector.extract_strided_slice %24 {offsets = [0, 0], sizes = [4, 1], strides = [1, 1]} : vector<4x4xf32> to vector<4x1xf32>
    %26 = vector.extract_strided_slice %1 {offsets = [0, 0], sizes = [1, 256], strides = [1, 1]} : vector<4x256xf32> to vector<1x256xf32>
    %27 = vector.broadcast %25 : vector<4x1xf32> to vector<4x256xf32>
    %28 = vector.broadcast %26 : vector<1x256xf32> to vector<4x256xf32>
    %29 = arith.mulf %27, %28 : vector<4x256xf32>
    %30 = vector.extract_strided_slice %24 {offsets = [0, 1], sizes = [4, 1], strides = [1, 1]} : vector<4x4xf32> to vector<4x1xf32>
    %31 = vector.extract_strided_slice %1 {offsets = [1, 0], sizes = [1, 256], strides = [1, 1]} : vector<4x256xf32> to vector<1x256xf32>
    %32 = vector.broadcast %30 : vector<4x1xf32> to vector<4x256xf32>
    %33 = vector.broadcast %31 : vector<1x256xf32> to vector<4x256xf32>
    %34 = arith.mulf %32, %33 : vector<4x256xf32>
    %35 = arith.addf %29, %34 : vector<4x256xf32>
    %36 = vector.extract_strided_slice %24 {offsets = [0, 2], sizes = [4, 1], strides = [1, 1]} : vector<4x4xf32> to vector<4x1xf32>
    %37 = vector.extract_strided_slice %1 {offsets = [2, 0], sizes = [1, 256], strides = [1, 1]} : vector<4x256xf32> to vector<1x256xf32>
    %38 = vector.broadcast %36 : vector<4x1xf32> to vector<4x256xf32>
    %39 = vector.broadcast %37 : vector<1x256xf32> to vector<4x256xf32>
    %40 = arith.mulf %38, %39 : vector<4x256xf32>
    %41 = arith.addf %35, %40 : vector<4x256xf32>
    %42 = vector.extract_strided_slice %24 {offsets = [0, 3], sizes = [4, 1], strides = [1, 1]} : vector<4x4xf32> to vector<4x1xf32>
    %43 = vector.extract_strided_slice %1 {offsets = [3, 0], sizes = [1, 256], strides = [1, 1]} : vector<4x256xf32> to vector<1x256xf32>
    %44 = vector.broadcast %42 : vector<4x1xf32> to vector<4x256xf32>
    %45 = vector.broadcast %43 : vector<1x256xf32> to vector<4x256xf32>
    %46 = arith.mulf %44, %45 : vector<4x256xf32>
    %47 = arith.addf %41, %46 : vector<4x256xf32>
    %c0_10 = arith.constant 0 : index
    %c0_11 = arith.constant 0 : index
    %c0_12 = arith.constant 0 : index
    %48 = vector.load %arg4[%c0_10, %c0_11, %c0_12] : memref<4x4x1xf32, #tpu.memory_space<vmem>>, vector<1x4x1xf32>
    %49 = vector.shape_cast %48 : vector<1x4x1xf32> to vector<4x1xf32>
    %50 = vector.broadcast %49 : vector<4x1xf32> to vector<4x256xf32>
    %51 = arith.addf %47, %50 : vector<4x256xf32>
    %cst = arith.constant 0.000000e+00 : f32
    %52 = vector.broadcast %cst : f32 to vector<4x256xf32>
    %53 = arith.maximumf %51, %52 : vector<4x256xf32>
    %c1 = arith.constant 1 : index
    %c0_13 = arith.constant 0 : index
    %c0_14 = arith.constant 0 : index
    %54 = vector.load %arg3[%c1, %c0_13, %c0_14] : memref<4x4x4xf32, #tpu.memory_space<vmem>>, vector<1x4x4xf32>
    %55 = vector.shape_cast %54 : vector<1x4x4xf32> to vector<4x4xf32>
    %56 = vector.extract_strided_slice %55 {offsets = [0, 0], sizes = [4, 1], strides = [1, 1]} : vector<4x4xf32> to vector<4x1xf32>
    %57 = vector.extract_strided_slice %1 {offsets = [0, 0], sizes = [1, 256], strides = [1, 1]} : vector<4x256xf32> to vector<1x256xf32>
    %58 = vector.broadcast %56 : vector<4x1xf32> to vector<4x256xf32>
    %59 = vector.broadcast %57 : vector<1x256xf32> to vector<4x256xf32>
    %60 = arith.mulf %58, %59 : vector<4x256xf32>
    %61 = vector.extract_strided_slice %55 {offsets = [0, 1], sizes = [4, 1], strides = [1, 1]} : vector<4x4xf32> to vector<4x1xf32>
    %62 = vector.extract_strided_slice %1 {offsets = [1, 0], sizes = [1, 256], strides = [1, 1]} : vector<4x256xf32> to vector<1x256xf32>
    %63 = vector.broadcast %61 : vector<4x1xf32> to vector<4x256xf32>
    %64 = vector.broadcast %62 : vector<1x256xf32> to vector<4x256xf32>
    %65 = arith.mulf %63, %64 : vector<4x256xf32>
    %66 = arith.addf %60, %65 : vector<4x256xf32>
    %67 = vector.extract_strided_slice %55 {offsets = [0, 2], sizes = [4, 1], strides = [1, 1]} : vector<4x4xf32> to vector<4x1xf32>
    %68 = vector.extract_strided_slice %1 {offsets = [2, 0], sizes = [1, 256], strides = [1, 1]} : vector<4x256xf32> to vector<1x256xf32>
    %69 = vector.broadcast %67 : vector<4x1xf32> to vector<4x256xf32>
    %70 = vector.broadcast %68 : vector<1x256xf32> to vector<4x256xf32>
    %71 = arith.mulf %69, %70 : vector<4x256xf32>
    %72 = arith.addf %66, %71 : vector<4x256xf32>
    %73 = vector.extract_strided_slice %55 {offsets = [0, 3], sizes = [4, 1], strides = [1, 1]} : vector<4x4xf32> to vector<4x1xf32>
    %74 = vector.extract_strided_slice %1 {offsets = [3, 0], sizes = [1, 256], strides = [1, 1]} : vector<4x256xf32> to vector<1x256xf32>
    %75 = vector.broadcast %73 : vector<4x1xf32> to vector<4x256xf32>
    %76 = vector.broadcast %74 : vector<1x256xf32> to vector<4x256xf32>
    %77 = arith.mulf %75, %76 : vector<4x256xf32>
    %78 = arith.addf %72, %77 : vector<4x256xf32>
    %c1_15 = arith.constant 1 : index
    %c0_16 = arith.constant 0 : index
    %c0_17 = arith.constant 0 : index
    %79 = vector.load %arg4[%c1_15, %c0_16, %c0_17] : memref<4x4x1xf32, #tpu.memory_space<vmem>>, vector<1x4x1xf32>
    %80 = vector.shape_cast %79 : vector<1x4x1xf32> to vector<4x1xf32>
    %81 = vector.broadcast %80 : vector<4x1xf32> to vector<4x256xf32>
    %82 = arith.addf %78, %81 : vector<4x256xf32>
    %cst_18 = arith.constant 0.000000e+00 : f32
    %83 = vector.broadcast %cst_18 : f32 to vector<4x256xf32>
    %84 = arith.maximumf %82, %83 : vector<4x256xf32>
    %c2 = arith.constant 2 : index
    %c0_19 = arith.constant 0 : index
    %c0_20 = arith.constant 0 : index
    %85 = vector.load %arg3[%c2, %c0_19, %c0_20] : memref<4x4x4xf32, #tpu.memory_space<vmem>>, vector<1x4x4xf32>
    %86 = vector.shape_cast %85 : vector<1x4x4xf32> to vector<4x4xf32>
    %87 = vector.extract_strided_slice %86 {offsets = [0, 0], sizes = [4, 1], strides = [1, 1]} : vector<4x4xf32> to vector<4x1xf32>
    %88 = vector.extract_strided_slice %1 {offsets = [0, 0], sizes = [1, 256], strides = [1, 1]} : vector<4x256xf32> to vector<1x256xf32>
    %89 = vector.broadcast %87 : vector<4x1xf32> to vector<4x256xf32>
    %90 = vector.broadcast %88 : vector<1x256xf32> to vector<4x256xf32>
    %91 = arith.mulf %89, %90 : vector<4x256xf32>
    %92 = vector.extract_strided_slice %86 {offsets = [0, 1], sizes = [4, 1], strides = [1, 1]} : vector<4x4xf32> to vector<4x1xf32>
    %93 = vector.extract_strided_slice %1 {offsets = [1, 0], sizes = [1, 256], strides = [1, 1]} : vector<4x256xf32> to vector<1x256xf32>
    %94 = vector.broadcast %92 : vector<4x1xf32> to vector<4x256xf32>
    %95 = vector.broadcast %93 : vector<1x256xf32> to vector<4x256xf32>
    %96 = arith.mulf %94, %95 : vector<4x256xf32>
    %97 = arith.addf %91, %96 : vector<4x256xf32>
    %98 = vector.extract_strided_slice %86 {offsets = [0, 2], sizes = [4, 1], strides = [1, 1]} : vector<4x4xf32> to vector<4x1xf32>
    %99 = vector.extract_strided_slice %1 {offsets = [2, 0], sizes = [1, 256], strides = [1, 1]} : vector<4x256xf32> to vector<1x256xf32>
    %100 = vector.broadcast %98 : vector<4x1xf32> to vector<4x256xf32>
    %101 = vector.broadcast %99 : vector<1x256xf32> to vector<4x256xf32>
    %102 = arith.mulf %100, %101 : vector<4x256xf32>
    %103 = arith.addf %97, %102 : vector<4x256xf32>
    %104 = vector.extract_strided_slice %86 {offsets = [0, 3], sizes = [4, 1], strides = [1, 1]} : vector<4x4xf32> to vector<4x1xf32>
    %105 = vector.extract_strided_slice %1 {offsets = [3, 0], sizes = [1, 256], strides = [1, 1]} : vector<4x256xf32> to vector<1x256xf32>
    %106 = vector.broadcast %104 : vector<4x1xf32> to vector<4x256xf32>
    %107 = vector.broadcast %105 : vector<1x256xf32> to vector<4x256xf32>
    %108 = arith.mulf %106, %107 : vector<4x256xf32>
    %109 = arith.addf %103, %108 : vector<4x256xf32>
    %c2_21 = arith.constant 2 : index
    %c0_22 = arith.constant 0 : index
    %c0_23 = arith.constant 0 : index
    %110 = vector.load %arg4[%c2_21, %c0_22, %c0_23] : memref<4x4x1xf32, #tpu.memory_space<vmem>>, vector<1x4x1xf32>
    %111 = vector.shape_cast %110 : vector<1x4x1xf32> to vector<4x1xf32>
    %112 = vector.broadcast %111 : vector<4x1xf32> to vector<4x256xf32>
    %113 = arith.addf %109, %112 : vector<4x256xf32>
    %cst_24 = arith.constant 0.000000e+00 : f32
    %114 = vector.broadcast %cst_24 : f32 to vector<4x256xf32>
    %115 = arith.maximumf %113, %114 : vector<4x256xf32>
    %c3 = arith.constant 3 : index
    %c0_25 = arith.constant 0 : index
    %c0_26 = arith.constant 0 : index
    %116 = vector.load %arg3[%c3, %c0_25, %c0_26] : memref<4x4x4xf32, #tpu.memory_space<vmem>>, vector<1x4x4xf32>
    %117 = vector.shape_cast %116 : vector<1x4x4xf32> to vector<4x4xf32>
    %118 = vector.extract_strided_slice %117 {offsets = [0, 0], sizes = [4, 1], strides = [1, 1]} : vector<4x4xf32> to vector<4x1xf32>
    %119 = vector.extract_strided_slice %1 {offsets = [0, 0], sizes = [1, 256], strides = [1, 1]} : vector<4x256xf32> to vector<1x256xf32>
    %120 = vector.broadcast %118 : vector<4x1xf32> to vector<4x256xf32>
    %121 = vector.broadcast %119 : vector<1x256xf32> to vector<4x256xf32>
    %122 = arith.mulf %120, %121 : vector<4x256xf32>
    %123 = vector.extract_strided_slice %117 {offsets = [0, 1], sizes = [4, 1], strides = [1, 1]} : vector<4x4xf32> to vector<4x1xf32>
    %124 = vector.extract_strided_slice %1 {offsets = [1, 0], sizes = [1, 256], strides = [1, 1]} : vector<4x256xf32> to vector<1x256xf32>
    %125 = vector.broadcast %123 : vector<4x1xf32> to vector<4x256xf32>
    %126 = vector.broadcast %124 : vector<1x256xf32> to vector<4x256xf32>
    %127 = arith.mulf %125, %126 : vector<4x256xf32>
    %128 = arith.addf %122, %127 : vector<4x256xf32>
    %129 = vector.extract_strided_slice %117 {offsets = [0, 2], sizes = [4, 1], strides = [1, 1]} : vector<4x4xf32> to vector<4x1xf32>
    %130 = vector.extract_strided_slice %1 {offsets = [2, 0], sizes = [1, 256], strides = [1, 1]} : vector<4x256xf32> to vector<1x256xf32>
    %131 = vector.broadcast %129 : vector<4x1xf32> to vector<4x256xf32>
    %132 = vector.broadcast %130 : vector<1x256xf32> to vector<4x256xf32>
    %133 = arith.mulf %131, %132 : vector<4x256xf32>
    %134 = arith.addf %128, %133 : vector<4x256xf32>
    %135 = vector.extract_strided_slice %117 {offsets = [0, 3], sizes = [4, 1], strides = [1, 1]} : vector<4x4xf32> to vector<4x1xf32>
    %136 = vector.extract_strided_slice %1 {offsets = [3, 0], sizes = [1, 256], strides = [1, 1]} : vector<4x256xf32> to vector<1x256xf32>
    %137 = vector.broadcast %135 : vector<4x1xf32> to vector<4x256xf32>
    %138 = vector.broadcast %136 : vector<1x256xf32> to vector<4x256xf32>
    %139 = arith.mulf %137, %138 : vector<4x256xf32>
    %140 = arith.addf %134, %139 : vector<4x256xf32>
    %c3_27 = arith.constant 3 : index
    %c0_28 = arith.constant 0 : index
    %c0_29 = arith.constant 0 : index
    %141 = vector.load %arg4[%c3_27, %c0_28, %c0_29] : memref<4x4x1xf32, #tpu.memory_space<vmem>>, vector<1x4x1xf32>
    %142 = vector.shape_cast %141 : vector<1x4x1xf32> to vector<4x1xf32>
    %143 = vector.broadcast %142 : vector<4x1xf32> to vector<4x256xf32>
    %144 = arith.addf %140, %143 : vector<4x256xf32>
    %cst_30 = arith.constant 0.000000e+00 : f32
    %145 = vector.broadcast %cst_30 : f32 to vector<4x256xf32>
    %146 = arith.maximumf %144, %145 : vector<4x256xf32>
    %147 = vector.extract_strided_slice %115 {offsets = [0, 0], sizes = [4, 16], strides = [1, 1]} : vector<4x256xf32> to vector<4x16xf32>
    %148 = vector.extract_strided_slice %115 {offsets = [0, 0], sizes = [4, 240], strides = [1, 1]} : vector<4x256xf32> to vector<4x240xf32>
    %149 = tpu.concatenate %147, %148 in 1 : vector<4x16xf32>, vector<4x240xf32> -> vector<4x256xf32>
    %150 = vector.shape_cast %4 : vector<1x256xi1> to vector<1x256xi1>
    %151 = vector.broadcast %150 : vector<1x256xi1> to vector<4x256xi1>
    %152 = arith.select %151, %53, %149 : vector<4x256xi1>, vector<4x256xf32>
    %153 = vector.extract_strided_slice %84 {offsets = [0, 0], sizes = [4, 1], strides = [1, 1]} : vector<4x256xf32> to vector<4x1xf32>
    %154 = vector.extract_strided_slice %84 {offsets = [0, 0], sizes = [4, 255], strides = [1, 1]} : vector<4x256xf32> to vector<4x255xf32>
    %155 = tpu.concatenate %153, %154 in 1 : vector<4x1xf32>, vector<4x255xf32> -> vector<4x256xf32>
    %156 = vector.shape_cast %22 : vector<1x256xi1> to vector<1x256xi1>
    %157 = vector.broadcast %156 : vector<1x256xi1> to vector<4x256xi1>
    %158 = arith.select %157, %53, %155 : vector<4x256xi1>, vector<4x256xf32>
    %159 = vector.extract_strided_slice %146 {offsets = [0, 0], sizes = [4, 17], strides = [1, 1]} : vector<4x256xf32> to vector<4x17xf32>
    %160 = vector.extract_strided_slice %146 {offsets = [0, 0], sizes = [4, 239], strides = [1, 1]} : vector<4x256xf32> to vector<4x239xf32>
    %161 = tpu.concatenate %159, %160 in 1 : vector<4x17xf32>, vector<4x239xf32> -> vector<4x256xf32>
    %162 = vector.shape_cast %22 : vector<1x256xi1> to vector<1x256xi1>
    %163 = vector.broadcast %162 : vector<1x256xi1> to vector<4x256xi1>
    %164 = arith.select %163, %152, %161 : vector<4x256xi1>, vector<4x256xf32>
    %165 = vector.shape_cast %4 : vector<1x256xi1> to vector<1x256xi1>
    %166 = vector.broadcast %165 : vector<1x256xi1> to vector<4x256xi1>
    %167 = arith.select %166, %158, %164 : vector<4x256xi1>, vector<4x256xf32>
    %168 = arith.addf %53, %152 : vector<4x256xf32>
    %169 = arith.addf %168, %158 : vector<4x256xf32>
    %170 = arith.addf %169, %167 : vector<4x256xf32>
    %cst_31 = arith.constant 2.500000e-01 : f32
    %171 = vector.broadcast %cst_31 : f32 to vector<4x256xf32>
    %172 = arith.mulf %171, %170 : vector<4x256xf32>
    %c0_32 = arith.constant 0 : index
    %c0_33 = arith.constant 0 : index
    %c0_34 = arith.constant 0 : index
    %c0_35 = arith.constant 0 : index
    %173 = vector.load %arg5[%c0_32, %c0_33, %c0_34, %c0_35] : memref<1x4x4x256xf32, #tpu.memory_space<vmem>>, vector<1x1x4x256xf32>
    %174 = vector.shape_cast %173 : vector<1x1x4x256xf32> to vector<4x256xf32>
    %175 = vector.shape_cast %172 : vector<4x256xf32> to vector<1x1x4x256xf32>
    tpu.vector_store %arg5[%c0_32, %c0_33, %c0_34, %c0_35], %175 {strides = array<i32>} : memref<1x4x4x256xf32, #tpu.memory_space<vmem>>, vector<1x1x4x256xf32>,
    %176 = vector.extract_strided_slice %146 {offsets = [0, 0], sizes = [4, 16], strides = [1, 1]} : vector<4x256xf32> to vector<4x16xf32>
    %177 = vector.extract_strided_slice %146 {offsets = [0, 0], sizes = [4, 240], strides = [1, 1]} : vector<4x256xf32> to vector<4x240xf32>
    %178 = tpu.concatenate %176, %177 in 1 : vector<4x16xf32>, vector<4x240xf32> -> vector<4x256xf32>
    %179 = vector.shape_cast %4 : vector<1x256xi1> to vector<1x256xi1>
    %180 = vector.broadcast %179 : vector<1x256xi1> to vector<4x256xi1>
    %181 = arith.select %180, %84, %178 : vector<4x256xi1>, vector<4x256xf32>
    %182 = vector.extract_strided_slice %115 {offsets = [0, 0], sizes = [4, 16], strides = [1, 1]} : vector<4x256xf32> to vector<4x16xf32>
    %183 = vector.extract_strided_slice %115 {offsets = [0, 0], sizes = [4, 240], strides = [1, 1]} : vector<4x256xf32> to vector<4x240xf32>
    %184 = tpu.concatenate %182, %183 in 1 : vector<4x16xf32>, vector<4x240xf32> -> vector<4x256xf32>
    %185 = vector.shape_cast %4 : vector<1x256xi1> to vector<1x256xi1>
    %186 = vector.broadcast %185 : vector<1x256xi1> to vector<4x256xi1>
    %187 = arith.select %186, %53, %184 : vector<4x256xi1>, vector<4x256xf32>
    %188 = arith.addf %84, %181 : vector<4x256xf32>
    %189 = arith.addf %188, %53 : vector<4x256xf32>
    %190 = arith.addf %189, %187 : vector<4x256xf32>
    %cst_36 = arith.constant 2.500000e-01 : f32
    %191 = vector.broadcast %cst_36 : f32 to vector<4x256xf32>
    %192 = arith.mulf %191, %190 : vector<4x256xf32>
    %c0_37 = arith.constant 0 : index
    %c1_38 = arith.constant 1 : index
    %c0_39 = arith.constant 0 : index
    %c0_40 = arith.constant 0 : index
    %193 = vector.load %arg5[%c0_37, %c1_38, %c0_39, %c0_40] : memref<1x4x4x256xf32, #tpu.memory_space<vmem>>, vector<1x1x4x256xf32>
    %194 = vector.shape_cast %193 : vector<1x1x4x256xf32> to vector<4x256xf32>
    %195 = vector.shape_cast %192 : vector<4x256xf32> to vector<1x1x4x256xf32>
    tpu.vector_store %arg5[%c0_37, %c1_38, %c0_39, %c0_40], %195 {strides = array<i32>} : memref<1x4x4x256xf32, #tpu.memory_space<vmem>>, vector<1x1x4x256xf32>,
    %196 = vector.extract_strided_slice %146 {offsets = [0, 0], sizes = [4, 1], strides = [1, 1]} : vector<4x256xf32> to vector<4x1xf32>
    %197 = vector.extract_strided_slice %146 {offsets = [0, 0], sizes = [4, 255], strides = [1, 1]} : vector<4x256xf32> to vector<4x255xf32>
    %198 = tpu.concatenate %196, %197 in 1 : vector<4x1xf32>, vector<4x255xf32> -> vector<4x256xf32>
    %199 = vector.shape_cast %22 : vector<1x256xi1> to vector<1x256xi1>
    %200 = vector.broadcast %199 : vector<1x256xi1> to vector<4x256xi1>
    %201 = arith.select %200, %115, %198 : vector<4x256xi1>, vector<4x256xf32>
    %202 = vector.extract_strided_slice %84 {offsets = [0, 0], sizes = [4, 1], strides = [1, 1]} : vector<4x256xf32> to vector<4x1xf32>
    %203 = vector.extract_strided_slice %84 {offsets = [0, 0], sizes = [4, 255], strides = [1, 1]} : vector<4x256xf32> to vector<4x255xf32>
    %204 = tpu.concatenate %202, %203 in 1 : vector<4x1xf32>, vector<4x255xf32> -> vector<4x256xf32>
    %205 = vector.shape_cast %22 : vector<1x256xi1> to vector<1x256xi1>
    %206 = vector.broadcast %205 : vector<1x256xi1> to vector<4x256xi1>
    %207 = arith.select %206, %53, %204 : vector<4x256xi1>, vector<4x256xf32>
    %208 = arith.addf %115, %53 : vector<4x256xf32>
    %209 = arith.addf %208, %201 : vector<4x256xf32>
    %210 = arith.addf %209, %207 : vector<4x256xf32>
    %cst_41 = arith.constant 2.500000e-01 : f32
    %211 = vector.broadcast %cst_41 : f32 to vector<4x256xf32>
    %212 = arith.mulf %211, %210 : vector<4x256xf32>
    %c0_42 = arith.constant 0 : index
    %c2_43 = arith.constant 2 : index
    %c0_44 = arith.constant 0 : index
    %c0_45 = arith.constant 0 : index
    %213 = vector.load %arg5[%c0_42, %c2_43, %c0_44, %c0_45] : memref<1x4x4x256xf32, #tpu.memory_space<vmem>>, vector<1x1x4x256xf32>
    %214 = vector.shape_cast %213 : vector<1x1x4x256xf32> to vector<4x256xf32>
    %215 = vector.shape_cast %212 : vector<4x256xf32> to vector<1x1x4x256xf32>
    tpu.vector_store %arg5[%c0_42, %c2_43, %c0_44, %c0_45], %215 {strides = array<i32>} : memref<1x4x4x256xf32, #tpu.memory_space<vmem>>, vector<1x1x4x256xf32>,
    %216 = arith.addf %146, %84 : vector<4x256xf32>
    %217 = arith.addf %216, %115 : vector<4x256xf32>
    %218 = arith.addf %217, %53 : vector<4x256xf32>
    %cst_46 = arith.constant 2.500000e-01 : f32
    %219 = vector.broadcast %cst_46 : f32 to vector<4x256xf32>
    %220 = arith.mulf %219, %218 : vector<4x256xf32>
    %c0_47 = arith.constant 0 : index
    %c3_48 = arith.constant 3 : index
    %c0_49 = arith.constant 0 : index
    %c0_50 = arith.constant 0 : index
    %221 = vector.load %arg5[%c0_47, %c3_48, %c0_49, %c0_50] : memref<1x4x4x256xf32, #tpu.memory_space<vmem>>, vector<1x1x4x256xf32>
    %222 = vector.shape_cast %221 : vector<1x1x4x256xf32> to vector<4x256xf32>
    %223 = vector.shape_cast %220 : vector<4x256xf32> to vector<1x1x4x256xf32>
    tpu.vector_store %arg5[%c0_47, %c3_48, %c0_49, %c0_50], %223 {strides = array<i32>} : memref<1x4x4x256xf32, #tpu.memory_space<vmem>>, vector<1x1x4x256xf32>,
    return
  }
  func.func @transform_0(%arg0: i32, %arg1: i32) -> (i32, i32, i32) {
    %c0_i32 = arith.constant 0 : i32
    %c0_i32_0 = arith.constant 0 : i32
    %c0_i32_1 = arith.constant 0 : i32
    return %arg0, %c0_i32, %c0_i32_0 : i32, i32, i32
  }
  func.func @transform_1(%arg0: i32, %arg1: i32) -> (i32, i32, i32) {
    %c0_i32 = arith.constant 0 : i32
    %c0_i32_0 = arith.constant 0 : i32
    %c0_i32_1 = arith.constant 0 : i32
    return %c0_i32, %arg1, %c0_i32_0 : i32, i32, i32
  }
  func.func @transform_2(%arg0: i32, %arg1: i32) -> (i32, i32, i32) {
    %c0_i32 = arith.constant 0 : i32
    %c0_i32_0 = arith.constant 0 : i32
    %c0_i32_1 = arith.constant 0 : i32
    return %c0_i32, %arg1, %c0_i32_0 : i32, i32, i32
  }
  func.func @transform_3(%arg0: i32, %arg1: i32) -> (i32, i32, i32, i32) {
    %c0_i32 = arith.constant 0 : i32
    %c0_i32_0 = arith.constant 0 : i32
    %c0_i32_1 = arith.constant 0 : i32
    return %arg0, %c0_i32, %arg1, %c0_i32_0 : i32, i32, i32, i32
  }
}

</mosaic_0001>

<bundles_post_ra>
// kernel: custom_pixel_shuffle_icnr.1
= control target key start
LH: loop header
LB: loop body
LE: loop exit
PB: predicated region body
PF: predicated region fallthrough
CT: control target
= control target key end

     0   :  { %s865_s12 = smov 0   ;;  %s867_s13 = smov 0   ;;  %s1052_s0 = inlined_call_operand.vmem [shape: f32[2,4,256], index: 0, kind: input, shape index: {}]   ;;  %s1053_s1 = inlined_call_operand.vmem [shape: f32[4,4,4], index: 1, kind: input, shape index: {}]   ;;  %s1054_s2 = inlined_call_operand.vmem [shape: f32[4,4,1], index: 2, kind: input, shape index: {}]   ;;  %s1055_s3 = inlined_call_operand.vmem [shape: f32[2,4,4,256], index: 3, kind: output, shape index: {}]  }
   0x1   :  { %s869_s14 = smov 0  }
   0x2 LB: > { %s25_s15 = sadd.s32 1, %s832_s13  ;;  %p750_p0 = scmp.ge.s32.totalorder %s836_s14, 1  ;;  %s836_s14 = sphi %s869_s14, %s13_s14   ;;  %s832_s13 = sphi %s867_s13, %s1061_s13   ;;  %s828_s12 = sphi %s865_s12, %s1060_s12  }
   0x3   : > { %p27_p1 = scmp.ge.s32.totalorder %s25_s15, 2  ;;  %p169_p2 = scmp.lt.s32.totalorder %s836_s14, 3 }
   0x5   : > { %s1063_s15 = smov (%p27_p1, %s25_s15), 0  ;;  %p170_p3 = pnand %p750_p0, %p169_p2 }
   0x6   : > { %v759_v0 = vld [vmem:[%s1053_s1 + $0xc] sm:$0xf] (!%p170_p3)  ;;  %v757_v1 = vld [vmem:[%s1053_s1 + $0x8] sm:$0xf] (!%p170_p3)  ;;  %v838_v2 = vmov (!%p170_p3), 0   ;;  %v839_v3 = vmov (!%p170_p3), 1   ;;  %v228_v14 = vlaneseq (!%p170_p3) }
   0x7   : > { %173 = sbr.rel (%p170_p3) target bundleno = 317 (0x13d), region = 32  ;;  %801 = vset.pattern.permute.xlu1 (!%p170_p3), %v838_v2  ;;  %799 = vset.pattern.permute.xlu0 (!%p170_p3), %v838_v2  ;;  %v755_v4 = vld [vmem:[%s1053_s1 + $0x4] sm:$0xf] (!%p170_p3)  ;;  %v840_v5 = vmov (!%p170_p3), 2   ;;  %v841_v6 = vmov (!%p170_p3), 3   ;;  %p205_p4 = scmp.lt.s32.totalorder (!%p170_p3), %s828_s12, 1 }
   0x8   : > { %466 = vperm.xlu1 (!%p170_p3), %801, %v759_v0   ;;  %422 = vperm.xlu0 (!%p170_p3), %799, %v757_v1   ;;  %v760_v7 = vld [vmem:[%s1054_s2 + $0xc] sm:$0xf] (!%p170_p3)  ;;  %v259_v8 = vld [vmem:[%s1053_s1] sm:$0xf] (!%p170_p3)  ;;  %v758_v9 = vld [vmem:[%s1054_s2 + $0x8] sm:$0xf] (!%p170_p3) }
   0x9   : > { %v364_v10 = vld [vmem:[%s1054_s2] sm:$0xf] (!%p170_p3)  ;;  %v756_v11 = vld [vmem:[%s1054_s2 + $0x4] sm:$0xf] (!%p170_p3)  ;;  %v267_v16 = vshrl.u32 (!%p170_p3), %v228_v14, 7  ;;  %s842_s9 = smov (!%p170_p3), 16  }
   0xa   : > { %s843_s10 = smov (!%p170_p3), 1   ;;  %s844_s11 = smov (!%p170_p3), 17   ;;  %vm512_vm0 = vcmask (!%p170_p3), 130048   ;;  %vm529_vm2 = vcmask (!%p170_p3), 7168   ;;  %vm546_vm4 = vcmask (!%p170_p3), 138240  }
   0xb   : > { %v268_v19 = vsub.s32 (!%p170_p3), 0, %v267_v16  ;;  %v292_v20 = vsub.s32 (!%p170_p3), 1, %v267_v16  ;;  %v272_v22 = vsub.s32 (!%p170_p3), 4, %v267_v16  ;;  %v296_v23 = vsub.s32 (!%p170_p3), 5, %v267_v16 }
   0xc   : > { %802 = vset.pattern.permute.xlu1 (!%p170_p3), %v839_v3  ;;  %800 = vset.pattern.permute.xlu0 (!%p170_p3), %v839_v3  ;;  %v318_v25 = vsub.s32 (!%p170_p3), 2, %v267_v16  ;;  %v322_v26 = vsub.s32 (!%p170_p3), 6, %v267_v16  ;;  %v344_v32 = vsub.s32 (!%p170_p3), 3, %v267_v16  ;;  %v348_v33 = vsub.s32 (!%p170_p3), 7, %v267_v16 }
   0xd   : > { %472 = vperm.xlu1 (!%p170_p3), %802, %v759_v0   ;;  %428 = vperm.xlu0 (!%p170_p3), %800, %v757_v1  }
   0xe   : > { %s1065_s12 = smov (!%p205_p4, %s828_s12), 1 }
   0xf   : > { %s766_s5 = sshll.u32 %s1065_s12, 3  ;;  %s767_s16 = sshll.u32 %s1065_s12, 5 }
  0x10   : > { %s209_s8 = scalar_lea.vmem %s1052_s0, %s766_s5  ;;  %s992_s19 = scalar_lea.vmem %s1055_s3, %s767_s16 }
  0x11   : > { %803 = vset.pattern.permute.xlu1 %v838_v2  ;;  %384 = vperm.xlu0 %800, %v755_v4   ;;  %v227_v21 = vld [vmem:[%s209_s8] sm:$0xff] }
  0x12   : > { %378 = vperm.xlu1 %803, %v755_v4   ;;  %v269_v27 = vrot.slane %v227_v21, %v268_v19  ;;  %v293_v28 = vrot.slane %v227_v21, %v292_v20  ;;  %v273_v30 = vrot.slane %v227_v21, %v272_v22  ;;  %v297_v31 = vrot.slane %v227_v21, %v296_v23 }
  0x13   : > { %v319_v34 = vrot.slane %v227_v21, %v318_v25  ;;  %v323_v35 = vrot.slane %v227_v21, %v322_v26  ;;  %v345_v42 = vrot.slane %v227_v21, %v344_v32  ;;  %v349_v45 = vrot.slane %v227_v21, %v348_v33 }
  0x14   : > { %v920_v36 = vrot.slane %v269_v27, %v268_v19  ;;  %v922_v37 = vrot.slane %v293_v28, %v292_v20  ;;  %v924_v40 = vrot.slane %v273_v30, %v268_v19  ;;  %v926_v41 = vrot.slane %v297_v31, %v292_v20 }
  0x15   : > { %805 = vset.pattern.permute.xlu0 %v840_v5  ;;  %v932_v48 = vrot.slane %v319_v34, %v318_v25  ;;  %v934_v49 = vrot.slane %v323_v35, %v318_v25  ;;  %v937_v51 = vrot.slane %v345_v42, %v344_v32  ;;  %v940_v56 = vrot.slane %v349_v45, %v344_v32 }
  0x16   : > { %804 = vset.pattern.permute.xlu1 %v840_v5  ;;  %480 = vperm.xlu0 %805, %v759_v0  }
  0x17   : > { %436 = vperm.xlu1 %804, %v757_v1  }
  0x1a   : > { %807 = vset.pattern.permute.xlu0 %v841_v6 }
  0x1b   : > { %392 = vperm.xlu1 %804, %v755_v4   ;;  %488 = vperm.xlu0 %807, %v759_v0  }
  0x1f   : > { %806 = vset.pattern.permute.xlu1 %v841_v6  ;;  %809 = vset.pattern.permute.xlu0 %v838_v2 }
  0x20   : > { %444 = vperm.xlu1 %806, %v757_v1   ;;  %499 = vperm.xlu0 %809, %v760_v7  }
  0x24   : > { %400 = vperm.xlu1 %806, %v755_v4   ;;  %810 = vset.pattern.permute.xlu0 %v839_v3 }
  0x25   : > { %287 = vperm.xlu0 %810, %v259_v8  }
  0x28   : > { %808 = vset.pattern.permute.xlu1 %v838_v2 }
  0x29   : > { %455 = vperm.xlu1 %808, %v758_v9   ;;  %813 = vset.pattern.permute.xlu0 %v838_v2 }
  0x2a   : > { %367 = vperm.xlu0 %813, %v364_v10  }
  0x2d   : > { %411 = vperm.xlu1 %808, %v756_v11  }
  0x31   : > { %262 = vperm.xlu1 %808, %v259_v8  }
  0x35   : > { %811 = vset.pattern.permute.xlu1 %v840_v5 }
  0x36   : > { %313 = vperm.xlu1 %811, %v259_v8  }
  0x3a   : > { %812 = vset.pattern.permute.xlu1 %v841_v6 }
  0x3b   : > { %339 = vperm.xlu1 %812, %v259_v8  }
  0x87   : > { %v467_v12 = vpop.permute.xlu1 %466  ;;  %v423_v13 = vpop.permute.xlu0 %422 }
  0x88   : > { %v425_v43 = vmul.f32 %v423_v13, %v920_v36  ;;  %v426_v46 = vmul.f32 %v423_v13, %v924_v40  ;;  %v469_v53 = vmul.f32 %v467_v12, %v920_v36  ;;  %v470_v5 = vmul.f32 %v467_v12, %v924_v40 }
  0x8c   : > { %v473_v15 = vpop.permute.xlu1 %472  ;;  %v429_v17 = vpop.permute.xlu0 %428 }
  0x8d   : > { %v431_v44 = vmul.f32 %v429_v17, %v922_v37  ;;  %v432_v47 = vmul.f32 %v429_v17, %v926_v41  ;;  %v475_v50 = vmul.f32 %v473_v15, %v922_v37  ;;  %v476_v61 = vmul.f32 %v473_v15, %v926_v41 }
  0x8f   : > { %v433_v54 = vadd.f32 %v431_v44, %v425_v43  ;;  %v434_v57 = vadd.f32 %v432_v47, %v426_v46  ;;  %v477_v0 = vadd.f32 %v475_v50, %v469_v53  ;;  %v478_v11 = vadd.f32 %v476_v61, %v470_v5 }
  0x90   : > { %v385_v24 = vpop.permute.xlu0 %384 }
  0x91   : > { %v918_v18 = vpop.permute.xlu1 %378  ;;  %v387_v63 = vmul.f32 %v385_v24, %v922_v37  ;;  %v388_v21 = vmul.f32 %v385_v24, %v926_v41 }
  0x92   : > { %v381_v62 = vmul.f32 %v918_v18, %v920_v36  ;;  %v382_v25 = vmul.f32 %v918_v18, %v924_v40 }
  0x94   : > { %v389_v13 = vadd.f32 %v387_v63, %v381_v62  ;;  %v390_v24 = vadd.f32 %v388_v21, %v382_v25 }
  0x95   : > { %v481_v38 = vpop.permute.xlu0 %480 }
  0x96   : > { %v437_v29 = vpop.permute.xlu1 %436  ;;  %v483_v58 = vmul.f32 %v481_v38, %v932_v48  ;;  %v484_v6 = vmul.f32 %v481_v38, %v934_v49 }
  0x97   : > { %v439_v59 = vmul.f32 %v437_v29, %v932_v48  ;;  %v440_v60 = vmul.f32 %v437_v29, %v934_v49 }
  0x98   : > { %v485_v7 = vadd.f32 %v483_v58, %v477_v0  ;;  %v486_v22 = vadd.f32 %v484_v6, %v478_v11 }
  0x99   : > { %v441_v8 = vadd.f32 %v439_v59, %v433_v54  ;;  %v442_v9 = vadd.f32 %v440_v60, %v434_v57 }
  0x9a   : > { %v393_v39 = vpop.permute.xlu1 %392  ;;  %v489_v55 = vpop.permute.xlu0 %488 }
  0x9b   : > { %v491_v1 = vmul.f32 %v489_v55, %v937_v51  ;;  %v395_v10 = vmul.f32 %v393_v39, %v932_v48  ;;  %v492_v15 = vmul.f32 %v489_v55, %v940_v56  ;;  %v396_v29 = vmul.f32 %v393_v39, %v934_v49 }
  0x9d   : > { %v493_v16 = vadd.f32 %v491_v1, %v485_v7  ;;  %v397_v26 = vadd.f32 %v395_v10, %v389_v13  ;;  %v494_v30 = vadd.f32 %v492_v15, %v486_v22  ;;  %v398_v18 = vadd.f32 %v396_v29, %v390_v24 }
  0x9f   : > { %v445_v52 = vpop.permute.xlu1 %444  ;;  %v500_v12 = vpop.permute.xlu0 %499 }
  0xa0   : > { %v447_v2 = vmul.f32 %v445_v52, %v937_v51  ;;  %v448_v3 = vmul.f32 %v445_v52, %v940_v56  ;;  %v502_v31 = vadd.f32 %v500_v12, %v493_v16  ;;  %v503_v43 = vadd.f32 %v500_v12, %v494_v30 }
  0xa2   : > { %v449_v19 = vadd.f32 %v447_v2, %v441_v8  ;;  %v450_v20 = vadd.f32 %v448_v3, %v442_v9  ;;  %v968_v39 = vmax.f32 %v502_v31, 0.0  ;;  %v505_v50 = vmax.f32 %v503_v43, 0.0 }
  0xa3   : > { %v401_v4 = vpop.permute.xlu1 %400 }
  0xa4   : > { %v403_v17 = vmul.f32 %v401_v4, %v937_v51  ;;  %v404_v38 = vmul.f32 %v401_v4, %v940_v56  ;;  %v288_v47 = vpop.permute.xlu0 %287 }
  0xa5   : > { %v308_v53 = vmul.f32 %v922_v37, %v288_v47  ;;  %v309_v54 = vmul.f32 %v926_v41, %v288_v47 }
  0xa6   : > { %v405_v34 = vadd.f32 %v403_v17, %v397_v26  ;;  %v406_v46 = vadd.f32 %v404_v38, %v398_v18  ;;  %v229_v17 = vand.u32 127, %v228_v14 }
  0xa8   : > { %v456_v23 = vpop.permute.xlu1 %455  ;;  %vm231_vm1 = vcmp.lt.s32.totalorder %v229_v17, 16  ;;  %v230_v25 = vadd.s32 128, %v229_v17 }
  0xa9   : > { %v458_v27 = vadd.f32 %v456_v23, %v449_v19  ;;  %v459_v28 = vadd.f32 %v456_v23, %v450_v20  ;;  %v368_v1 = vpop.permute.xlu0 %367  ;;  %v237_v23 = vand.u32 15, %v229_v17 }
  0xaa   : > { %v244_v24 = vand.u32 15, %v230_v25 }
  0xab   : > { %v961_v32 = vmax.f32 %v458_v27, 0.0  ;;  %v963_v33 = vmax.f32 %v459_v28, 0.0  ;;  %vm1007_vm3 = vcmp.eq.s32.totalorder %v237_v23, 0 }
  0xac   : > { %v412_v35 = vpop.permute.xlu1 %411  ;;  %vm1020_vm5 = vcmp.eq.s32.totalorder %v244_v24, 0 }
  0xad   : > { %v414_v42 = vadd.f32 %v412_v35, %v405_v34  ;;  %510 = vrot.lane.b32.xlu0 %v963_v33, %s842_s9  ;;  %508 = vrot.lane.b32.xlu1 %v961_v32, %s842_s9  ;;  %v415_v52 = vadd.f32 %v412_v35, %v406_v46 }
  0xaf   : > { %v970_v44 = vmax.f32 %v414_v42, 0.0  ;;  %v417_v59 = vmax.f32 %v415_v52, 0.0 }
  0xb0   : > { %v263_v45 = vpop.permute.xlu1 %262 }
  0xb1   : > { %568 = vrot.lane.b32.xlu1 %v968_v39, %s842_s9  ;;  %525 = vrot.lane.b32.xlu0 %v970_v44, %s843_s10  ;;  %v284_v55 = vmul.f32 %v920_v36, %v263_v45  ;;  %v285_v57 = vmul.f32 %v924_v40, %v263_v45  ;;  %v617_v2 = vadd.f32 %v505_v50, %v417_v59 }
  0xb3   : > { %v310_v62 = vadd.f32 %v308_v53, %v284_v55  ;;  %v311_v63 = vadd.f32 %v309_v54, %v285_v57  ;;  %v619_v7 = vadd.f32 %v617_v2, %v963_v33 }
  0xb5   : > { %v314_v58 = vpop.permute.xlu1 %313  ;;  %570 = vrot.lane.b32.xlu1 %v505_v50, %s842_s9  ;;  %592 = vrot.lane.b32.xlu0 %v968_v39, %s843_s10 }
  0xb6   : > { %v334_v60 = vmul.f32 %v932_v48, %v314_v58  ;;  %v335_v61 = vmul.f32 %v934_v49, %v314_v58  ;;  %v616_v48 = vadd.f32 %v968_v39, %v970_v44 }
  0xb8   : > { %v336_v41 = vadd.f32 %v334_v60, %v310_v62  ;;  %v337_v36 = vadd.f32 %v335_v61, %v311_v63  ;;  %v618_v6 = vadd.f32 %v616_v48, %v961_v32 }
  0xb9   : > { %527 = vrot.lane.b32.xlu1 %v417_v59, %s843_s10  ;;  %542 = vrot.lane.b32.xlu0 %v968_v39, %s844_s11 }
  0xba   : > { %v340_v37 = vpop.permute.xlu1 %339 }
  0xbb   : > { %v360_v40 = vmul.f32 %v937_v51, %v340_v37  ;;  %v361_v0 = vmul.f32 %v940_v56, %v340_v37 }
  0xbd   : > { %594 = vrot.lane.b32.xlu1 %v505_v50, %s843_s10  ;;  %v362_v49 = vadd.f32 %v360_v40, %v336_v41  ;;  %v363_v3 = vadd.f32 %v361_v0, %v337_v36 }
  0xbf   : > { %v370_v4 = vadd.f32 %v368_v1, %v362_v49  ;;  %v371_v5 = vadd.f32 %v368_v1, %v363_v3 }
  0xc1   : > { %v372_v8 = vmax.f32 %v370_v4, 0.0  ;;  %v373_v9 = vmax.f32 %v371_v5, 0.0  ;;  %544 = vrot.lane.b32.xlu1 %v505_v50, %s844_s11 }
  0xc3   : > { %v620_v51 = vadd.f32 %v618_v6, %v372_v8  ;;  %v621_v56 = vadd.f32 %v619_v7, %v373_v9  ;;  %v602_v47 = vadd.f32 %v961_v32, %v372_v8 }
  0xc5   : > { %v622_v10 = vmul.f32 0.25, %v620_v51  ;;  %v623_v11 = vmul.f32 0.25, %v621_v56 }
  0xc7   : > { %v626_v13 = vcombine.low %v622_v10, %v623_v11 }
  0xc9   : > { %763 = vst [vmem:[%s992_s19 + $0x18] sm:$0xff] %v626_v13 }
 0x11f   : > { %v511_v15 = vpop.permute.xlu0 %510  ;;  %v509_v16 = vpop.permute.xlu1 %508 }
 0x120   : > { %v516_v26 = vsel %vm512_vm0, %v961_v32, %v509_v16  ;;  %v513_v45 = vsel %vm512_vm0, %v509_v16, %v511_v15 }
 0x121   : > { %v521_v34 = vsel %vm231_vm1, %v372_v8, %v516_v26  ;;  %v556_v40 = vadd.f32 %v513_v45, %v373_v9 }
 0x122   : > { %v555_v61 = vadd.f32 %v521_v34, %v372_v8 }
 0x123   : > { %v569_v19 = vpop.permute.xlu1 %568  ;;  %v526_v21 = vpop.permute.xlu0 %525 }
 0x124   : > { %v575_v20 = vsel %vm512_vm0, %v968_v39, %v569_v19  ;;  %v533_v46 = vsel %vm529_vm2, %v970_v44, %v526_v21 }
 0x125   : > { %v576_v22 = vsel %vm231_vm1, %v970_v44, %v575_v20 }
 0x126   : > { %v578_v12 = vadd.f32 %v576_v22, %v970_v44 }
 0x127   : > { %v571_v27 = vpop.permute.xlu1 %570  ;;  %v593_v29 = vpop.permute.xlu0 %592 }
 0x128   : > { %v580_v28 = vadd.f32 %v578_v12, %v372_v8  ;;  %v572_v14 = vsel %vm512_vm0, %v569_v19, %v571_v27  ;;  %v599_v31 = vsel %vm529_vm2, %v968_v39, %v593_v29 }
 0x129   : > { %v579_v30 = vadd.f32 %v572_v14, %v417_v59  ;;  %v600_v18 = vsel %vm1007_vm3, %v961_v32, %v599_v31  ;;  %v538_v32 = vsel %vm1007_vm3, %v372_v8, %v533_v46 }
 0x12a   : > { %v582_v38 = vadd.f32 %v580_v28, %v521_v34  ;;  %v604_v54 = vadd.f32 %v602_v47, %v600_v18  ;;  %v557_v0 = vadd.f32 %v555_v61, %v538_v32 }
 0x12b   : > { %v581_v42 = vadd.f32 %v579_v30, %v373_v9  ;;  %v528_v43 = vpop.permute.xlu1 %527  ;;  %v543_v50 = vpop.permute.xlu0 %542 }
 0x12c   : > { %v550_v53 = vsel %vm546_vm4, %v968_v39, %v543_v50  ;;  %v530_v57 = vsel %vm529_vm2, %v526_v21, %v528_v43  ;;  %v584_v59 = vmul.f32 0.25, %v582_v38  ;;  %v603_v39 = vadd.f32 %v963_v33, %v373_v9 }
 0x12d   : > { %v583_v52 = vadd.f32 %v581_v42, %v513_v45  ;;  %v551_v58 = vsel %vm1007_vm3, %v521_v34, %v550_v53  ;;  %v539_v37 = vsel %vm1020_vm5, %v373_v9, %v530_v57  ;;  %v606_v1 = vadd.f32 %v604_v54, %v538_v32 }
 0x12e   : > { %v553_v41 = vsel %vm231_vm1, %v538_v32, %v551_v58  ;;  %v558_v49 = vadd.f32 %v556_v40, %v539_v37 }
 0x12f   : > { %v585_v44 = vmul.f32 0.25, %v583_v52  ;;  %v595_v60 = vpop.permute.xlu1 %594  ;;  %v559_v3 = vadd.f32 %v557_v0, %v553_v41  ;;  %v608_v7 = vmul.f32 0.25, %v606_v1 }
 0x130   : > { %v596_v62 = vsel %vm529_vm2, %v593_v29, %v595_v60 }
 0x131   : > { %v588_v63 = vcombine.low %v584_v59, %v585_v44  ;;  %v601_v36 = vsel %vm1020_vm5, %v963_v33, %v596_v62  ;;  %v561_v33 = vmul.f32 0.25, %v559_v3 }
 0x132   : > { %v605_v48 = vadd.f32 %v603_v39, %v601_v36 }
 0x133   : > { %761 = vst [vmem:[%s992_s19 + $0x8] sm:$0xff] %v588_v63  ;;  %v545_v2 = vpop.permute.xlu1 %544 }
 0x134   : > { %v607_v4 = vadd.f32 %v605_v48, %v539_v37  ;;  %v547_v5 = vsel %vm546_vm4, %v543_v50, %v545_v2 }
 0x135   : > { %v552_v6 = vsel %vm1020_vm5, %v513_v45, %v547_v5 }
 0x136   : > { %v609_v8 = vmul.f32 0.25, %v607_v4  ;;  %v560_v51 = vadd.f32 %v558_v49, %v552_v6 }
 0x138   : > { %v612_v9 = vcombine.low %v608_v7, %v609_v8  ;;  %v562_v56 = vmul.f32 0.25, %v560_v51 }
 0x13a   : > { %762 = vst [vmem:[%s992_s19 + $0x10] sm:$0xff] %v612_v9  ;;  %v565_v10 = vcombine.low %v561_v33, %v562_v56 }
 0x13c   : > { %567 = vst [vmem:[%s992_s19] sm:$0xff] %v565_v10 }
 0x13d PF: > { %s13_s14 = sadd.s32 1, %s836_s14   ;;  %s1060_s12 = smov %s832_s13 }
 0x13e   : > { %p10_p5 = scmp.ge.s32.totalorder %s13_s14, 4   ;;  %s1061_s13 = smov %s1063_s15 }
 0x140   :  { %12 = sbr.rel (!%p10_p5) target bundleno = 2 (0x2), region = 77 }

</bundles_post_ra>
